<compile_context>
chip_gen: v6e
topology: v6e:2x2x1
jax: 0.10.0
libtpu: 0.0.40
codegen_flags: <defaults>
</compile_context>

<pallas_src>
import functools

import jax
import jax.numpy as jnp
from jax.experimental import pallas as pl
from jax.experimental.pallas import tpu as pltpu


# ---------------------------------------------------------------------------
# Pallas kernel: one (batch element, row-of-blocks) per grid step.
# ---------------------------------------------------------------------------
def _graph_proj_kernel(x_ref, c1_ref, c2_ref, c0_ref, invs_ref, as_ref,
                       sa_ref, nodes_ref, *, bnum, eps):
    # Block shapes:
    #   x_ref     : (1, C, h, W)           one row of spatial blocks (NCHW slice)
    #   c1_ref    : (1, bnod, C, W)        -0.5 / sigma^2, broadcast along W
    #   c2_ref    : (1, bnod, C, W)        anchor / sigma^2, broadcast along W
    #   c0_ref    : (1, bnod, 1, W)        -0.5 * ||anchor/sigma||^2, broadcast
    #   invs_ref  : (1, bnum, bnod, C)     1 / sigma        (per block column)
    #   as_ref    : (1, bnum, bnod, C)     anchor / sigma   (per block column)
    #   sa_ref    : (1, 1, bnum*bnod, h, w)   soft-assignment output slab
    #   nodes_ref : (1, 1, bnum, bnod, C)     un-normalized node features
    C = x_ref.shape[1]
    W = x_ref.shape[3]
    w = W // bnum
    bnod = c1_ref.shape[1]

    xg = x_ref[0].astype(jnp.float32)            # (C, h, W)
    c1m = c1_ref[0]                              # (bnod, C, W)
    c2m = c2_ref[0]                              # (bnod, C, W)

    # logits[k,i,j] = -0.5 * ||(x[:,i,j] - anchor[k]) / sigma[k]||^2, expanded
    # into C broadcast-FMAs on the VPU, lane-dense over the whole block row.
    logits = c0_ref[0]                           # (bnod, 1, W) -> broadcasts on h
    for c in range(C):                           # static unroll, C == dim (small)
        xc = xg[c:c + 1]                         # (1, h, W)
        logits = logits + c1m[:, c:c + 1, :] * (xc * xc) + c2m[:, c:c + 1, :] * xc
    # logits: (bnod, h, W)

    # Per-pixel softmax over the bnod nodes of each block (block id only
    # changes with lane position, so the whole row goes at once).
    m = jnp.max(logits, axis=0, keepdims=True)   # (1, h, W)
    e = jnp.exp(logits - m)                      # (bnod, h, W)
    den = jnp.sum(e, axis=0, keepdims=True)      # (1, h, W)
    sa = e * pl.reciprocal(den, approx=False)    # (bnod, h, W)

    # Per spatial block of the row: store its soft-assignment slab and do the
    # weighted residual aggregation.  Static loop over bnum (small) so the
    # slice offsets stay compile-time constants.
    for gj in range(bnum):
        sag = sa[:, :, gj * w:(gj + 1) * w]      # (bnod, h, w)
        xgj = xg[:, :, gj * w:(gj + 1) * w]      # (C, h, w)

        lo = gj * bnod
        sa_ref[0, 0, lo:lo + bnod, :, :] = sag.astype(sa_ref.dtype)

        invs = invs_ref[0, gj]                   # (bnod, C)
        a_s = as_ref[0, gj]                      # (bnod, C)

        # S0[k] = sum_p sa[k,p];  S1[k,c] = sum_p sa[k,p] * x[c,p]
        s0 = jnp.sum(jnp.sum(sag, axis=2), axis=1, keepdims=True)       # (bnod, 1)
        cols = []
        for c in range(C):                       # static unroll, C == dim
            cols.append(jnp.sum(jnp.sum(sag * xgj[c:c + 1], axis=2),
                                axis=1, keepdims=True))                 # (bnod, 1)
        s1 = jnp.concatenate(cols, axis=1)                              # (bnod, C)

        # nodes[k,c] = (S1[k,c]/sigma - (anchor/sigma)*S0[k]) / (S0[k] + eps)
        # approx reciprocal: per-node scale error cancels under the downstream
        # per-node L2 normalization.
        nodes_blk = (invs * s1 - a_s * s0) * pl.reciprocal(s0 + eps, approx=True)
        nodes_ref[0, 0, gj, :, :] = nodes_blk.astype(nodes_ref.dtype)


# ---------------------------------------------------------------------------
# Wrapper: f32 parameter precompute, pallas_call, tiny epilogue.
# ---------------------------------------------------------------------------
def graph_projection(x, anchor, sigma_param, bnum, bnod,
                     normalize_input=False, eps=1e-9):
    B, C, H, W = x.shape
    h, w = H // bnum, W // bnum
    n = h * w
    num_blocks = bnum * bnum
    node_num = num_blocks * bnod

    if normalize_input:
        nrm = jnp.sqrt(jnp.sum(x * x, axis=1, keepdims=True))
        x = x / jnp.maximum(nrm, 1e-12)

    # Parameter-sized precompute (once per call, f32).
    sigma = jax.nn.sigmoid(sigma_param.astype(jnp.float32))
    inv_s = 1.0 / sigma                                   # (node_num, C)
    a_s = anchor.astype(jnp.float32) * inv_s              # anchor / sigma
    c1 = -0.5 * inv_s * inv_s                             # coeff of x^2
    c2 = a_s * inv_s                                      # coeff of x
    c0 = -0.5 * jnp.sum(a_s * a_s, axis=1)                # (node_num,)

    # Regroup by (block row, block col, node); pre-broadcast the per-pixel
    # logits coefficients along W so the kernel runs lane-dense per block row.
    def by_block(p):                                      # (node_num, C) ->
        return p.reshape(bnum, bnum, bnod, C)             # (gi, gj, k, c)

    def row_map(p):
        t = by_block(p).transpose(0, 2, 3, 1)             # (gi, k, c, gj)
        return jnp.repeat(t, w, axis=-1)                  # (gi, k, c, W)

    c1_map = row_map(c1)                                  # (bnum, bnod, C, W)
    c2_map = row_map(c2)                                  # (bnum, bnod, C, W)
    c0_map = jnp.repeat(c0.reshape(bnum, bnum, bnod).transpose(0, 2, 1),
                        w, axis=-1)[:, :, None, :]        # (bnum, bnod, 1, W)
    inv_s_g = by_block(inv_s)                             # (bnum, bnum, bnod, C)
    a_s_g = by_block(a_s)                                 # (bnum, bnum, bnod, C)

    # Explicit per-step VMEM budget (double-buffered ins/outs + row temps):
    # avoids spurious OOM under v5e's 16 MiB scoped default without ever
    # over-asking v7x's 64 MiB physical VMEM.
    bpe = jnp.dtype(x.dtype).itemsize
    in_bytes = (C * h * W * bpe + (2 * bnod * C + bnod) * W * 4
                + 2 * bnum * bnod * C * 4)
    out_bytes = bnum * bnod * (h * w + C) * bpe
    tmp_bytes = 8 * bnod * h * W * 4
    vmem_limit = int(min(max(2 * (in_bytes + out_bytes) + tmp_bytes + (4 << 20),
                             16 << 20), 64 << 20))

    kernel = functools.partial(_graph_proj_kernel, bnum=bnum, eps=eps)
    sa, nodes = pl.pallas_call(
        kernel,
        out_shape=(
            jax.ShapeDtypeStruct((B, bnum, bnum * bnod, h, w), x.dtype),
            jax.ShapeDtypeStruct((B, bnum, bnum, bnod, C), x.dtype),
        ),
        grid=(B, bnum),
        in_specs=[
            pl.BlockSpec((1, C, h, W), lambda b, gi: (b, 0, gi, 0)),
            pl.BlockSpec((1, bnod, C, W), lambda b, gi: (gi, 0, 0, 0)),
            pl.BlockSpec((1, bnod, C, W), lambda b, gi: (gi, 0, 0, 0)),
            pl.BlockSpec((1, bnod, 1, W), lambda b, gi: (gi, 0, 0, 0)),
            pl.BlockSpec((1, bnum, bnod, C), lambda b, gi: (gi, 0, 0, 0)),
            pl.BlockSpec((1, bnum, bnod, C), lambda b, gi: (gi, 0, 0, 0)),
        ],
        out_specs=(
            pl.BlockSpec((1, 1, bnum * bnod, h, w),
                         lambda b, gi: (b, gi, 0, 0, 0)),
            pl.BlockSpec((1, 1, bnum, bnod, C),
                         lambda b, gi: (b, gi, 0, 0, 0)),
        ),
        compiler_params=pltpu.CompilerParams(
            dimension_semantics=("parallel", "parallel"),
            vmem_limit_bytes=vmem_limit),
    )(x, c1_map, c2_map, c0_map, inv_s_g, a_s_g)

    # Free contiguous reshapes back to the module's layouts.
    soft_assign = sa.reshape(B, node_num, n)
    nodes = nodes.reshape(B, node_num, C).astype(jnp.float32)

    # Tiny epilogue (node_num*C values per batch element): two L2
    # normalizations + final transpose, kept in plain JAX (jit-fused).
    nrm = jnp.sqrt(jnp.sum(nodes * nodes, axis=2, keepdims=True))
    nodes = nodes / jnp.maximum(nrm, 1e-12)
    flat = nodes.reshape(B, node_num * C)
    nrm2 = jnp.sqrt(jnp.sum(flat * flat, axis=1, keepdims=True))
    flat = flat / jnp.maximum(nrm2, 1e-12)
    nodes_out = flat.reshape(B, node_num, C).transpose(0, 2, 1).astype(x.dtype)
    return nodes_out, soft_assign


# ---------------------------------------------------------------------------
# Pure-JAX reference mirroring the PyTorch loop structure (for validation)
# ---------------------------------------------------------------------------
def graph_projection_ref(x, anchor, sigma_param, bnum, bnod, eps=1e-9):
    B, C, H, W = x.shape
    h, w = H // bnum, W // bnum
    n = h * w
    node_num = bnum * bnum * bnod
    sigma = jax.nn.sigmoid(sigma_param)

    residuals, logits = [], []
    for node_id in range(node_num):
        block_id = node_id // bnod
        hs = (block_id // bnum) * h
        ws = (block_id % bnum) * w
        tmp = x[:, :, hs:hs + h, ws:ws + w].reshape(B, C, n).transpose(0, 2, 1)
        residual = (tmp - anchor[node_id]) / sigma[node_id]
        residuals.append(residual)
        logits.append(-0.5 * jnp.sum(residual ** 2, axis=2))
    logits = jnp.stack(logits, axis=1)                      # (B, node_num, n)

    sa_parts = []
    for block_id in range(bnum * bnum):
        sl = logits[:, block_id * bnod:(block_id + 1) * bnod, :]
        sa_parts.append(jax.nn.softmax(sl, axis=1))
    soft_assign = jnp.concatenate(sa_parts, axis=1)

    nodes = []
    for node_id in range(node_num):
        r = residuals[node_id]
        sa = soft_assign[:, node_id, :]
        nd = jnp.sum(r * sa[:, :, None], axis=1) / (
            jnp.sum(sa, axis=1, keepdims=True) + eps)
        nodes.append(nd)
    nodes = jnp.stack(nodes, axis=1)                        # (B, node_num, C)
    nodes = nodes / jnp.maximum(
        jnp.linalg.norm(nodes, axis=2, keepdims=True), 1e-12)
    flat = nodes.reshape(B, -1)
    flat = flat / jnp.maximum(
        jnp.linalg.norm(flat, axis=1, keepdims=True), 1e-12)
    return flat.reshape(B, node_num, C).transpose(0, 2, 1), soft_assign


if __name__ == "__main__":
    # Small shapes consistent with the module: B=2, C(dim)=4, H=W=16,
    # bnum=2, bnod=2 -> node_num = 8, h=w=8, n=64.
    B, C, H, W = 2, 4, 16, 16
    bnum, bnod = 2, 2
    node_num = bnum * bnum * bnod

    key = jax.random.PRNGKey(0)
    kx, ka, ks = jax.random.split(key, 3)
    x = jax.random.normal(kx, (B, C, H, W), dtype=jnp.float32)
    anchor = jax.random.uniform(ka, (node_num, C), dtype=jnp.float32)   # torch.rand
    sigma_p = jax.random.uniform(ks, (node_num, C), dtype=jnp.float32)  # torch.rand

    fn = jax.jit(functools.partial(graph_projection, bnum=bnum, bnod=bnod))
    nodes, soft_assign = fn(x, anchor, sigma_p)
    nodes = jax.block_until_ready(nodes)
    soft_assign = jax.block_until_ready(soft_assign)

    nodes_ref, sa_ref = graph_projection_ref(x, anchor, sigma_p, bnum, bnod)
    assert nodes.shape == (B, C, node_num)
    assert soft_assign.shape == (B, node_num, (H // bnum) * (W // bnum))
    assert jnp.allclose(nodes, nodes_ref, rtol=2e-4, atol=1e-5)
    assert jnp.allclose(soft_assign, sa_ref, rtol=2e-4, atol=1e-5)

    print("KERNEL_OK")
</pallas_src>

<mosaic_0001>
module attributes {stable_mosaic.version = 11 : i64} {
  func.func @_graph_proj_kernel(%arg0: i32, %arg1: i32, %arg2: memref<1x4x8x16xf32, #tpu.memory_space<vmem>>, %arg3: memref<1x2x4x16xf32, #tpu.memory_space<vmem>>, %arg4: memref<1x2x4x16xf32, #tpu.memory_space<vmem>>, %arg5: memref<1x2x1x16xf32, #tpu.memory_space<vmem>>, %arg6: memref<1x2x2x4xf32, #tpu.memory_space<vmem>>, %arg7: memref<1x2x2x4xf32, #tpu.memory_space<vmem>>, %arg8: memref<1x1x4x8x8xf32, #tpu.memory_space<vmem>>, %arg9: memref<1x1x2x2x4xf32, #tpu.memory_space<vmem>>) attributes {dimension_semantics = [#tpu.dimension_semantics<parallel>, #tpu.dimension_semantics<parallel>], iteration_bounds = array<i64: 2, 2>, scalar_prefetch = 0 : i64, scratch_operands = 0 : i64, tpu.core_type = #tpu.core_type<tc>, window_params = [{transform_indices = @transform_0, window_bounds = array<i64: 1, 4, 8, 16>}, {transform_indices = @transform_1, window_bounds = array<i64: 1, 2, 4, 16>}, {transform_indices = @transform_2, window_bounds = array<i64: 1, 2, 4, 16>}, {transform_indices = @transform_3, window_bounds = array<i64: 1, 2, 1, 16>}, {transform_indices = @transform_4, window_bounds = array<i64: 1, 2, 2, 4>}, {transform_indices = @transform_5, window_bounds = array<i64: 1, 2, 2, 4>}, {transform_indices = @transform_6, window_bounds = array<i64: 1, 1, 4, 8, 8>}, {transform_indices = @transform_7, window_bounds = array<i64: 1, 1, 2, 2, 4>}]} {
    %c0 = arith.constant 0 : index
    %c0_0 = arith.constant 0 : index
    %c0_1 = arith.constant 0 : index
    %c0_2 = arith.constant 0 : index
    %0 = vector.load %arg2[%c0, %c0_0, %c0_1, %c0_2] : memref<1x4x8x16xf32, #tpu.memory_space<vmem>>, vector<1x4x8x16xf32>
    %1 = vector.shape_cast %0 : vector<1x4x8x16xf32> to vector<4x8x16xf32>
    %c0_3 = arith.constant 0 : index
    %c0_4 = arith.constant 0 : index
    %c0_5 = arith.constant 0 : index
    %c0_6 = arith.constant 0 : index
    %2 = vector.load %arg3[%c0_3, %c0_4, %c0_5, %c0_6] : memref<1x2x4x16xf32, #tpu.memory_space<vmem>>, vector<1x2x4x16xf32>
    %3 = vector.shape_cast %2 : vector<1x2x4x16xf32> to vector<2x4x16xf32>
    %c0_7 = arith.constant 0 : index
    %c0_8 = arith.constant 0 : index
    %c0_9 = arith.constant 0 : index
    %c0_10 = arith.constant 0 : index
    %4 = vector.load %arg4[%c0_7, %c0_8, %c0_9, %c0_10] : memref<1x2x4x16xf32, #tpu.memory_space<vmem>>, vector<1x2x4x16xf32>
    %5 = vector.shape_cast %4 : vector<1x2x4x16xf32> to vector<2x4x16xf32>
    %c0_11 = arith.constant 0 : index
    %c0_12 = arith.constant 0 : index
    %c0_13 = arith.constant 0 : index
    %c0_14 = arith.constant 0 : index
    %6 = vector.load %arg5[%c0_11, %c0_12, %c0_13, %c0_14] : memref<1x2x1x16xf32, #tpu.memory_space<vmem>>, vector<1x2x1x16xf32>
    %7 = vector.shape_cast %6 : vector<1x2x1x16xf32> to vector<2x1x16xf32>
    %8 = vector.extract_strided_slice %1 {offsets = [0, 0, 0], sizes = [1, 8, 16], strides = [1, 1, 1]} : vector<4x8x16xf32> to vector<1x8x16xf32>
    %9 = vector.extract_strided_slice %3 {offsets = [0, 0, 0], sizes = [2, 1, 16], strides = [1, 1, 1]} : vector<2x4x16xf32> to vector<2x1x16xf32>
    %10 = arith.mulf %8, %8 : vector<1x8x16xf32>
    %11 = vector.broadcast %9 : vector<2x1x16xf32> to vector<2x8x16xf32>
    %12 = vector.broadcast %10 : vector<1x8x16xf32> to vector<2x8x16xf32>
    %13 = arith.mulf %11, %12 : vector<2x8x16xf32>
    %14 = vector.broadcast %7 : vector<2x1x16xf32> to vector<2x8x16xf32>
    %15 = arith.addf %14, %13 : vector<2x8x16xf32>
    %16 = vector.extract_strided_slice %5 {offsets = [0, 0, 0], sizes = [2, 1, 16], strides = [1, 1, 1]} : vector<2x4x16xf32> to vector<2x1x16xf32>
    %17 = vector.broadcast %16 : vector<2x1x16xf32> to vector<2x8x16xf32>
    %18 = vector.broadcast %8 : vector<1x8x16xf32> to vector<2x8x16xf32>
    %19 = arith.mulf %17, %18 : vector<2x8x16xf32>
    %20 = arith.addf %15, %19 : vector<2x8x16xf32>
    %21 = vector.extract_strided_slice %1 {offsets = [1, 0, 0], sizes = [1, 8, 16], strides = [1, 1, 1]} : vector<4x8x16xf32> to vector<1x8x16xf32>
    %22 = vector.extract_strided_slice %3 {offsets = [0, 1, 0], sizes = [2, 1, 16], strides = [1, 1, 1]} : vector<2x4x16xf32> to vector<2x1x16xf32>
    %23 = arith.mulf %21, %21 : vector<1x8x16xf32>
    %24 = vector.broadcast %22 : vector<2x1x16xf32> to vector<2x8x16xf32>
    %25 = vector.broadcast %23 : vector<1x8x16xf32> to vector<2x8x16xf32>
    %26 = arith.mulf %24, %25 : vector<2x8x16xf32>
    %27 = arith.addf %20, %26 : vector<2x8x16xf32>
    %28 = vector.extract_strided_slice %5 {offsets = [0, 1, 0], sizes = [2, 1, 16], strides = [1, 1, 1]} : vector<2x4x16xf32> to vector<2x1x16xf32>
    %29 = vector.broadcast %28 : vector<2x1x16xf32> to vector<2x8x16xf32>
    %30 = vector.broadcast %21 : vector<1x8x16xf32> to vector<2x8x16xf32>
    %31 = arith.mulf %29, %30 : vector<2x8x16xf32>
    %32 = arith.addf %27, %31 : vector<2x8x16xf32>
    %33 = vector.extract_strided_slice %1 {offsets = [2, 0, 0], sizes = [1, 8, 16], strides = [1, 1, 1]} : vector<4x8x16xf32> to vector<1x8x16xf32>
    %34 = vector.extract_strided_slice %3 {offsets = [0, 2, 0], sizes = [2, 1, 16], strides = [1, 1, 1]} : vector<2x4x16xf32> to vector<2x1x16xf32>
    %35 = arith.mulf %33, %33 : vector<1x8x16xf32>
    %36 = vector.broadcast %34 : vector<2x1x16xf32> to vector<2x8x16xf32>
    %37 = vector.broadcast %35 : vector<1x8x16xf32> to vector<2x8x16xf32>
    %38 = arith.mulf %36, %37 : vector<2x8x16xf32>
    %39 = arith.addf %32, %38 : vector<2x8x16xf32>
    %40 = vector.extract_strided_slice %5 {offsets = [0, 2, 0], sizes = [2, 1, 16], strides = [1, 1, 1]} : vector<2x4x16xf32> to vector<2x1x16xf32>
    %41 = vector.broadcast %40 : vector<2x1x16xf32> to vector<2x8x16xf32>
    %42 = vector.broadcast %33 : vector<1x8x16xf32> to vector<2x8x16xf32>
    %43 = arith.mulf %41, %42 : vector<2x8x16xf32>
    %44 = arith.addf %39, %43 : vector<2x8x16xf32>
    %45 = vector.extract_strided_slice %1 {offsets = [3, 0, 0], sizes = [1, 8, 16], strides = [1, 1, 1]} : vector<4x8x16xf32> to vector<1x8x16xf32>
    %46 = vector.extract_strided_slice %3 {offsets = [0, 3, 0], sizes = [2, 1, 16], strides = [1, 1, 1]} : vector<2x4x16xf32> to vector<2x1x16xf32>
    %47 = arith.mulf %45, %45 : vector<1x8x16xf32>
    %48 = vector.broadcast %46 : vector<2x1x16xf32> to vector<2x8x16xf32>
    %49 = vector.broadcast %47 : vector<1x8x16xf32> to vector<2x8x16xf32>
    %50 = arith.mulf %48, %49 : vector<2x8x16xf32>
    %51 = arith.addf %44, %50 : vector<2x8x16xf32>
    %52 = vector.extract_strided_slice %5 {offsets = [0, 3, 0], sizes = [2, 1, 16], strides = [1, 1, 1]} : vector<2x4x16xf32> to vector<2x1x16xf32>
    %53 = vector.broadcast %52 : vector<2x1x16xf32> to vector<2x8x16xf32>
    %54 = vector.broadcast %45 : vector<1x8x16xf32> to vector<2x8x16xf32>
    %55 = arith.mulf %53, %54 : vector<2x8x16xf32>
    %56 = arith.addf %51, %55 : vector<2x8x16xf32>
    %cst = arith.constant dense<0xFF800000> : vector<8x16xf32>
    %57 = vector.multi_reduction <maximumf>, %56, %cst [0] : vector<2x8x16xf32> to vector<8x16xf32>
    %58 = vector.shape_cast %57 : vector<8x16xf32> to vector<1x8x16xf32>
    %59 = vector.broadcast %58 : vector<1x8x16xf32> to vector<2x8x16xf32>
    %60 = arith.subf %56, %59 : vector<2x8x16xf32>
    %61 = math.exp %60 : vector<2x8x16xf32>
    %cst_15 = arith.constant dense<0.000000e+00> : vector<8x16xf32>
    %62 = vector.multi_reduction <add>, %61, %cst_15 [0] : vector<2x8x16xf32> to vector<8x16xf32>
    %63 = vector.shape_cast %62 : vector<8x16xf32> to vector<1x8x16xf32>
    %64 = tpu.reciprocal %63 : vector<1x8x16xf32> -> vector<1x8x16xf32>
    %65 = vector.broadcast %64 : vector<1x8x16xf32> to vector<2x8x16xf32>
    %66 = arith.mulf %61, %65 : vector<2x8x16xf32>
    %67 = vector.extract_strided_slice %66 {offsets = [0, 0, 0], sizes = [2, 8, 8], strides = [1, 1, 1]} : vector<2x8x16xf32> to vector<2x8x8xf32>
    %68 = vector.extract_strided_slice %1 {offsets = [0, 0, 0], sizes = [4, 8, 8], strides = [1, 1, 1]} : vector<4x8x16xf32> to vector<4x8x8xf32>
    %c0_16 = arith.constant 0 : index
    %c0_17 = arith.constant 0 : index
    %c0_18 = arith.constant 0 : index
    %c0_19 = arith.constant 0 : index
    %c0_20 = arith.constant 0 : index
    %69 = vector.load %arg8[%c0_16, %c0_17, %c0_18, %c0_19, %c0_20] : memref<1x1x4x8x8xf32, #tpu.memory_space<vmem>>, vector<1x1x2x8x8xf32>
    %70 = vector.shape_cast %69 : vector<1x1x2x8x8xf32> to vector<2x8x8xf32>
    %71 = vector.shape_cast %67 : vector<2x8x8xf32> to vector<1x1x2x8x8xf32>
    tpu.vector_store %arg8[%c0_16, %c0_17, %c0_18, %c0_19, %c0_20], %71 {strides = array<i32>} : memref<1x1x4x8x8xf32, #tpu.memory_space<vmem>>, vector<1x1x2x8x8xf32>,
    %c0_21 = arith.constant 0 : index
    %c0_22 = arith.constant 0 : index
    %c0_23 = arith.constant 0 : index
    %c0_24 = arith.constant 0 : index
    %72 = vector.load %arg6[%c0_21, %c0_22, %c0_23, %c0_24] : memref<1x2x2x4xf32, #tpu.memory_space<vmem>>, vector<1x1x2x4xf32>
    %73 = vector.shape_cast %72 : vector<1x1x2x4xf32> to vector<2x4xf32>
    %c0_25 = arith.constant 0 : index
    %c0_26 = arith.constant 0 : index
    %c0_27 = arith.constant 0 : index
    %c0_28 = arith.constant 0 : index
    %74 = vector.load %arg7[%c0_25, %c0_26, %c0_27, %c0_28] : memref<1x2x2x4xf32, #tpu.memory_space<vmem>>, vector<1x1x2x4xf32>
    %75 = vector.shape_cast %74 : vector<1x1x2x4xf32> to vector<2x4xf32>
    %cst_29 = arith.constant dense<0.000000e+00> : vector<2x8xf32>
    %76 = vector.multi_reduction <add>, %67, %cst_29 [2] : vector<2x8x8xf32> to vector<2x8xf32>
    %cst_30 = arith.constant dense<0.000000e+00> : vector<2xf32>
    %77 = vector.multi_reduction <add>, %76, %cst_30 [1] : vector<2x8xf32> to vector<2xf32>
    %78 = vector.shape_cast %77 : vector<2xf32> to vector<2x1xf32>
    %79 = vector.extract_strided_slice %68 {offsets = [0, 0, 0], sizes = [1, 8, 8], strides = [1, 1, 1]} : vector<4x8x8xf32> to vector<1x8x8xf32>
    %80 = vector.broadcast %79 : vector<1x8x8xf32> to vector<2x8x8xf32>
    %81 = arith.mulf %67, %80 : vector<2x8x8xf32>
    %cst_31 = arith.constant dense<0.000000e+00> : vector<2x8xf32>
    %82 = vector.multi_reduction <add>, %81, %cst_31 [2] : vector<2x8x8xf32> to vector<2x8xf32>
    %cst_32 = arith.constant dense<0.000000e+00> : vector<2xf32>
    %83 = vector.multi_reduction <add>, %82, %cst_32 [1] : vector<2x8xf32> to vector<2xf32>
    %84 = vector.shape_cast %83 : vector<2xf32> to vector<2x1xf32>
    %85 = vector.extract_strided_slice %68 {offsets = [1, 0, 0], sizes = [1, 8, 8], strides = [1, 1, 1]} : vector<4x8x8xf32> to vector<1x8x8xf32>
    %86 = vector.broadcast %85 : vector<1x8x8xf32> to vector<2x8x8xf32>
    %87 = arith.mulf %67, %86 : vector<2x8x8xf32>
    %cst_33 = arith.constant dense<0.000000e+00> : vector<2x8xf32>
    %88 = vector.multi_reduction <add>, %87, %cst_33 [2] : vector<2x8x8xf32> to vector<2x8xf32>
    %cst_34 = arith.constant dense<0.000000e+00> : vector<2xf32>
    %89 = vector.multi_reduction <add>, %88, %cst_34 [1] : vector<2x8xf32> to vector<2xf32>
    %90 = vector.shape_cast %89 : vector<2xf32> to vector<2x1xf32>
    %91 = vector.extract_strided_slice %68 {offsets = [2, 0, 0], sizes = [1, 8, 8], strides = [1, 1, 1]} : vector<4x8x8xf32> to vector<1x8x8xf32>
    %92 = vector.broadcast %91 : vector<1x8x8xf32> to vector<2x8x8xf32>
    %93 = arith.mulf %67, %92 : vector<2x8x8xf32>
    %cst_35 = arith.constant dense<0.000000e+00> : vector<2x8xf32>
    %94 = vector.multi_reduction <add>, %93, %cst_35 [2] : vector<2x8x8xf32> to vector<2x8xf32>
    %cst_36 = arith.constant dense<0.000000e+00> : vector<2xf32>
    %95 = vector.multi_reduction <add>, %94, %cst_36 [1] : vector<2x8xf32> to vector<2xf32>
    %96 = vector.shape_cast %95 : vector<2xf32> to vector<2x1xf32>
    %97 = vector.extract_strided_slice %68 {offsets = [3, 0, 0], sizes = [1, 8, 8], strides = [1, 1, 1]} : vector<4x8x8xf32> to vector<1x8x8xf32>
    %98 = vector.broadcast %97 : vector<1x8x8xf32> to vector<2x8x8xf32>
    %99 = arith.mulf %67, %98 : vector<2x8x8xf32>
    %cst_37 = arith.constant dense<0.000000e+00> : vector<2x8xf32>
    %100 = vector.multi_reduction <add>, %99, %cst_37 [2] : vector<2x8x8xf32> to vector<2x8xf32>
    %cst_38 = arith.constant dense<0.000000e+00> : vector<2xf32>
    %101 = vector.multi_reduction <add>, %100, %cst_38 [1] : vector<2x8xf32> to vector<2xf32>
    %102 = vector.shape_cast %101 : vector<2xf32> to vector<2x1xf32>
    %103 = tpu.concatenate %84, %90, %96, %102 in 1 : vector<2x1xf32>, vector<2x1xf32>, vector<2x1xf32>, vector<2x1xf32> -> vector<2x4xf32>
    %104 = arith.mulf %73, %103 : vector<2x4xf32>
    %105 = vector.broadcast %78 : vector<2x1xf32> to vector<2x4xf32>
    %106 = arith.mulf %75, %105 : vector<2x4xf32>
    %107 = arith.subf %104, %106 : vector<2x4xf32>
    %cst_39 = arith.constant 9.99999971E-10 : f32
    %108 = vector.broadcast %cst_39 : f32 to vector<2x1xf32>
    %109 = arith.addf %78, %108 : vector<2x1xf32>
    %110 = tpu.reciprocal %109 {approx = true} : vector<2x1xf32> -> vector<2x1xf32>
    %111 = vector.broadcast %110 : vector<2x1xf32> to vector<2x4xf32>
    %112 = arith.mulf %107, %111 : vector<2x4xf32>
    %c0_40 = arith.constant 0 : index
    %c0_41 = arith.constant 0 : index
    %c0_42 = arith.constant 0 : index
    %c0_43 = arith.constant 0 : index
    %c0_44 = arith.constant 0 : index
    %113 = vector.load %arg9[%c0_40, %c0_41, %c0_42, %c0_43, %c0_44] : memref<1x1x2x2x4xf32, #tpu.memory_space<vmem>>, vector<1x1x1x2x4xf32>
    %114 = vector.shape_cast %113 : vector<1x1x1x2x4xf32> to vector<2x4xf32>
    %115 = vector.shape_cast %112 : vector<2x4xf32> to vector<1x1x1x2x4xf32>
    tpu.vector_store %arg9[%c0_40, %c0_41, %c0_42, %c0_43, %c0_44], %115 {strides = array<i32>} : memref<1x1x2x2x4xf32, #tpu.memory_space<vmem>>, vector<1x1x1x2x4xf32>,
    %116 = vector.extract_strided_slice %66 {offsets = [0, 0, 8], sizes = [2, 8, 8], strides = [1, 1, 1]} : vector<2x8x16xf32> to vector<2x8x8xf32>
    %117 = vector.extract_strided_slice %1 {offsets = [0, 0, 8], sizes = [4, 8, 8], strides = [1, 1, 1]} : vector<4x8x16xf32> to vector<4x8x8xf32>
    %c0_45 = arith.constant 0 : index
    %c0_46 = arith.constant 0 : index
    %c2 = arith.constant 2 : index
    %c0_47 = arith.constant 0 : index
    %c0_48 = arith.constant 0 : index
    %118 = vector.load %arg8[%c0_45, %c0_46, %c2, %c0_47, %c0_48] : memref<1x1x4x8x8xf32, #tpu.memory_space<vmem>>, vector<1x1x2x8x8xf32>
    %119 = vector.shape_cast %118 : vector<1x1x2x8x8xf32> to vector<2x8x8xf32>
    %120 = vector.shape_cast %116 : vector<2x8x8xf32> to vector<1x1x2x8x8xf32>
    tpu.vector_store %arg8[%c0_45, %c0_46, %c2, %c0_47, %c0_48], %120 {strides = array<i32>} : memref<1x1x4x8x8xf32, #tpu.memory_space<vmem>>, vector<1x1x2x8x8xf32>,
    %c0_49 = arith.constant 0 : index
    %c1 = arith.constant 1 : index
    %c0_50 = arith.constant 0 : index
    %c0_51 = arith.constant 0 : index
    %121 = vector.load %arg6[%c0_49, %c1, %c0_50, %c0_51] : memref<1x2x2x4xf32, #tpu.memory_space<vmem>>, vector<1x1x2x4xf32>
    %122 = vector.shape_cast %121 : vector<1x1x2x4xf32> to vector<2x4xf32>
    %c0_52 = arith.constant 0 : index
    %c1_53 = arith.constant 1 : index
    %c0_54 = arith.constant 0 : index
    %c0_55 = arith.constant 0 : index
    %123 = vector.load %arg7[%c0_52, %c1_53, %c0_54, %c0_55] : memref<1x2x2x4xf32, #tpu.memory_space<vmem>>, vector<1x1x2x4xf32>
    %124 = vector.shape_cast %123 : vector<1x1x2x4xf32> to vector<2x4xf32>
    %cst_56 = arith.constant dense<0.000000e+00> : vector<2x8xf32>
    %125 = vector.multi_reduction <add>, %116, %cst_56 [2] : vector<2x8x8xf32> to vector<2x8xf32>
    %cst_57 = arith.constant dense<0.000000e+00> : vector<2xf32>
    %126 = vector.multi_reduction <add>, %125, %cst_57 [1] : vector<2x8xf32> to vector<2xf32>
    %127 = vector.shape_cast %126 : vector<2xf32> to vector<2x1xf32>
    %128 = vector.extract_strided_slice %117 {offsets = [0, 0, 0], sizes = [1, 8, 8], strides = [1, 1, 1]} : vector<4x8x8xf32> to vector<1x8x8xf32>
    %129 = vector.broadcast %128 : vector<1x8x8xf32> to vector<2x8x8xf32>
    %130 = arith.mulf %116, %129 : vector<2x8x8xf32>
    %cst_58 = arith.constant dense<0.000000e+00> : vector<2x8xf32>
    %131 = vector.multi_reduction <add>, %130, %cst_58 [2] : vector<2x8x8xf32> to vector<2x8xf32>
    %cst_59 = arith.constant dense<0.000000e+00> : vector<2xf32>
    %132 = vector.multi_reduction <add>, %131, %cst_59 [1] : vector<2x8xf32> to vector<2xf32>
    %133 = vector.shape_cast %132 : vector<2xf32> to vector<2x1xf32>
    %134 = vector.extract_strided_slice %117 {offsets = [1, 0, 0], sizes = [1, 8, 8], strides = [1, 1, 1]} : vector<4x8x8xf32> to vector<1x8x8xf32>
    %135 = vector.broadcast %134 : vector<1x8x8xf32> to vector<2x8x8xf32>
    %136 = arith.mulf %116, %135 : vector<2x8x8xf32>
    %cst_60 = arith.constant dense<0.000000e+00> : vector<2x8xf32>
    %137 = vector.multi_reduction <add>, %136, %cst_60 [2] : vector<2x8x8xf32> to vector<2x8xf32>
    %cst_61 = arith.constant dense<0.000000e+00> : vector<2xf32>
    %138 = vector.multi_reduction <add>, %137, %cst_61 [1] : vector<2x8xf32> to vector<2xf32>
    %139 = vector.shape_cast %138 : vector<2xf32> to vector<2x1xf32>
    %140 = vector.extract_strided_slice %117 {offsets = [2, 0, 0], sizes = [1, 8, 8], strides = [1, 1, 1]} : vector<4x8x8xf32> to vector<1x8x8xf32>
    %141 = vector.broadcast %140 : vector<1x8x8xf32> to vector<2x8x8xf32>
    %142 = arith.mulf %116, %141 : vector<2x8x8xf32>
    %cst_62 = arith.constant dense<0.000000e+00> : vector<2x8xf32>
    %143 = vector.multi_reduction <add>, %142, %cst_62 [2] : vector<2x8x8xf32> to vector<2x8xf32>
    %cst_63 = arith.constant dense<0.000000e+00> : vector<2xf32>
    %144 = vector.multi_reduction <add>, %143, %cst_63 [1] : vector<2x8xf32> to vector<2xf32>
    %145 = vector.shape_cast %144 : vector<2xf32> to vector<2x1xf32>
    %146 = vector.extract_strided_slice %117 {offsets = [3, 0, 0], sizes = [1, 8, 8], strides = [1, 1, 1]} : vector<4x8x8xf32> to vector<1x8x8xf32>
    %147 = vector.broadcast %146 : vector<1x8x8xf32> to vector<2x8x8xf32>
    %148 = arith.mulf %116, %147 : vector<2x8x8xf32>
    %cst_64 = arith.constant dense<0.000000e+00> : vector<2x8xf32>
    %149 = vector.multi_reduction <add>, %148, %cst_64 [2] : vector<2x8x8xf32> to vector<2x8xf32>
    %cst_65 = arith.constant dense<0.000000e+00> : vector<2xf32>
    %150 = vector.multi_reduction <add>, %149, %cst_65 [1] : vector<2x8xf32> to vector<2xf32>
    %151 = vector.shape_cast %150 : vector<2xf32> to vector<2x1xf32>
    %152 = tpu.concatenate %133, %139, %145, %151 in 1 : vector<2x1xf32>, vector<2x1xf32>, vector<2x1xf32>, vector<2x1xf32> -> vector<2x4xf32>
    %153 = arith.mulf %122, %152 : vector<2x4xf32>
    %154 = vector.broadcast %127 : vector<2x1xf32> to vector<2x4xf32>
    %155 = arith.mulf %124, %154 : vector<2x4xf32>
    %156 = arith.subf %153, %155 : vector<2x4xf32>
    %cst_66 = arith.constant 9.99999971E-10 : f32
    %157 = vector.broadcast %cst_66 : f32 to vector<2x1xf32>
    %158 = arith.addf %127, %157 : vector<2x1xf32>
    %159 = tpu.reciprocal %158 {approx = true} : vector<2x1xf32> -> vector<2x1xf32>
    %160 = vector.broadcast %159 : vector<2x1xf32> to vector<2x4xf32>
    %161 = arith.mulf %156, %160 : vector<2x4xf32>
    %c0_67 = arith.constant 0 : index
    %c0_68 = arith.constant 0 : index
    %c1_69 = arith.constant 1 : index
    %c0_70 = arith.constant 0 : index
    %c0_71 = arith.constant 0 : index
    %162 = vector.load %arg9[%c0_67, %c0_68, %c1_69, %c0_70, %c0_71] : memref<1x1x2x2x4xf32, #tpu.memory_space<vmem>>, vector<1x1x1x2x4xf32>
    %163 = vector.shape_cast %162 : vector<1x1x1x2x4xf32> to vector<2x4xf32>
    %164 = vector.shape_cast %161 : vector<2x4xf32> to vector<1x1x1x2x4xf32>
    tpu.vector_store %arg9[%c0_67, %c0_68, %c1_69, %c0_70, %c0_71], %164 {strides = array<i32>} : memref<1x1x2x2x4xf32, #tpu.memory_space<vmem>>, vector<1x1x1x2x4xf32>,
    return
  }
  func.func @transform_0(%arg0: i32, %arg1: i32) -> (i32, i32, i32, i32) {
    %c0_i32 = arith.constant 0 : i32
    %c0_i32_0 = arith.constant 0 : i32
    %c0_i32_1 = arith.constant 0 : i32
    return %arg0, %c0_i32, %arg1, %c0_i32_0 : i32, i32, i32, i32
  }
  func.func @transform_1(%arg0: i32, %arg1: i32) -> (i32, i32, i32, i32) {
    %c0_i32 = arith.constant 0 : i32
    %c0_i32_0 = arith.constant 0 : i32
    %c0_i32_1 = arith.constant 0 : i32
    %c0_i32_2 = arith.constant 0 : i32
    return %arg1, %c0_i32, %c0_i32_0, %c0_i32_1 : i32, i32, i32, i32
  }
  func.func @transform_2(%arg0: i32, %arg1: i32) -> (i32, i32, i32, i32) {
    %c0_i32 = arith.constant 0 : i32
    %c0_i32_0 = arith.constant 0 : i32
    %c0_i32_1 = arith.constant 0 : i32
    %c0_i32_2 = arith.constant 0 : i32
    return %arg1, %c0_i32, %c0_i32_0, %c0_i32_1 : i32, i32, i32, i32
  }
  func.func @transform_3(%arg0: i32, %arg1: i32) -> (i32, i32, i32, i32) {
    %c0_i32 = arith.constant 0 : i32
    %c0_i32_0 = arith.constant 0 : i32
    %c0_i32_1 = arith.constant 0 : i32
    %c0_i32_2 = arith.constant 0 : i32
    return %arg1, %c0_i32, %c0_i32_0, %c0_i32_1 : i32, i32, i32, i32
  }
  func.func @transform_4(%arg0: i32, %arg1: i32) -> (i32, i32, i32, i32) {
    %c0_i32 = arith.constant 0 : i32
    %c0_i32_0 = arith.constant 0 : i32
    %c0_i32_1 = arith.constant 0 : i32
    %c0_i32_2 = arith.constant 0 : i32
    return %arg1, %c0_i32, %c0_i32_0, %c0_i32_1 : i32, i32, i32, i32
  }
  func.func @transform_5(%arg0: i32, %arg1: i32) -> (i32, i32, i32, i32) {
    %c0_i32 = arith.constant 0 : i32
    %c0_i32_0 = arith.constant 0 : i32
    %c0_i32_1 = arith.constant 0 : i32
    %c0_i32_2 = arith.constant 0 : i32
    return %arg1, %c0_i32, %c0_i32_0, %c0_i32_1 : i32, i32, i32, i32
  }
  func.func @transform_6(%arg0: i32, %arg1: i32) -> (i32, i32, i32, i32, i32) {
    %c0_i32 = arith.constant 0 : i32
    %c0_i32_0 = arith.constant 0 : i32
    %c0_i32_1 = arith.constant 0 : i32
    %c0_i32_2 = arith.constant 0 : i32
    return %arg0, %arg1, %c0_i32, %c0_i32_0, %c0_i32_1 : i32, i32, i32, i32, i32
  }
  func.func @transform_7(%arg0: i32, %arg1: i32) -> (i32, i32, i32, i32, i32) {
    %c0_i32 = arith.constant 0 : i32
    %c0_i32_0 = arith.constant 0 : i32
    %c0_i32_1 = arith.constant 0 : i32
    %c0_i32_2 = arith.constant 0 : i32
    return %arg0, %arg1, %c0_i32, %c0_i32_0, %c0_i32_1 : i32, i32, i32, i32, i32
  }
}

</mosaic_0001>

<bundles_post_ra>
// kernel: graph_projection.1
= control target key start
LH: loop header
LB: loop body
LE: loop exit
PB: predicated region body
PF: predicated region fallthrough
CT: control target
= control target key end

     0   :  { %s1317_s24 = smov 0   ;;  %s1319_s25 = smov 0   ;;  %s1565_s0 = inlined_call_operand.vmem [shape: f32[2,4,16,16], index: 0, kind: input, shape index: {}]   ;;  %s1566_s1 = inlined_call_operand.vmem [shape: f32[2,2,4,16], index: 1, kind: input, shape index: {}]   ;;  %s1567_s2 = inlined_call_operand.vmem [shape: f32[2,2,4,16], index: 2, kind: input, shape index: {}]   ;;  %s1568_s3 = inlined_call_operand.vmem [shape: f32[2,2,1,16], index: 3, kind: input, shape index: {}]   ;;  %s1569_s4 = inlined_call_operand.vmem [shape: f32[2,2,2,4], index: 4, kind: input, shape index: {}]   ;;  %s1570_s5 = inlined_call_operand.vmem [shape: f32[2,2,2,4], index: 5, kind: input, shape index: {}]   ;;  %s1571_s6 = inlined_call_operand.vmem [shape: f32[2,2,4,8,8], index: 6, kind: output, shape index: {0}]   ;;  %s1572_s7 = inlined_call_operand.vmem [shape: f32[2,2,2,2,4], index: 7, kind: output, shape index: {1}]  }
   0x1   :  { %s1321_s26 = smov 0   ;;  %s1323_s27 = smov 0  }
   0x2   :  { %s1325_s28 = smov 0   ;;  %s1327_s29 = smov 0  }
   0x3   :  { %s1329_s30 = smov 0  }
   0x4 LB: > { %s27_s8 = sadd.s32 1, %s1266_s28  ;;  %s30_s9 = sadd.s32 1, %s1270_s29  ;;  %s1274_s30 = sphi %s1329_s30, %s18_s30   ;;  %s1270_s29 = sphi %s1327_s29, %s1578_s29   ;;  %s1266_s28 = sphi %s1325_s28, %s1577_s28   ;;  %s1262_s27 = sphi %s1323_s27, %s1576_s27   ;;  %s1258_s26 = sphi %s1321_s26, %s1575_s26   ;;  %s1254_s25 = sphi %s1319_s25, %s1574_s25   ;;  %s1250_s24 = sphi %s1317_s24, %s1573_s24  }
   0x5   : > { %p28_p0 = scmp.ge.s32.totalorder %s27_s8, 2  ;;  %p46_p1 = scmp.ne.s32.totalorder %s1254_s25, %s1250_s24 }
   0x6   : > { %p47_p2 = scmp.eq.s32.totalorder %s1274_s30, 0  ;;  %s39_s13 = sadd.s32 1, %s1254_s25 }
   0x7   : > { %s1580_s8 = smov (%p28_p0, %s27_s8), 0  ;;  %s1582_s9 = smov (!%p28_p0, %s30_s9), %s1270_s29 }
   0x8   : > { %p48_p3 = por %p47_p2, %p46_p1  ;;  %p32_p4 = scmp.ge.s32.totalorder %s1582_s9, 2 }
   0x9   : > { %s35_s10 = ssub.s32 %s1266_s28, %s1580_s8  ;;  %p1119_p6 = scmp.ge.s32.totalorder %s1274_s30, 4 }
   0xa   : > { %s1584_s9 = smov (%p32_p4, %s1582_s9), 0 }
   0xb   : > { %s34_s11 = ssub.s32 %s1270_s29, %s1584_s9  ;;  %258 = sbr.rel (%p1119_p6) target bundleno = 24 (0x18), region = 16 }
   0xc   : > { %s36_s12 = sor.u32 %s35_s10, %s34_s11 }
   0xd   : > { %p37_p5 = scmp.eq.s32.totalorder %s36_s12, 0 }
   0xf   : > { %s1368_s14 = scalar_select %p37_p5, %s1254_s25, %s39_s13  }
  0x10   : > { %261 = sbr.rel (!%p48_p3) target bundleno = 24 (0x18), region = 20  ;;  %s263_s15 = sand.u32 (%p48_p3), 1, %s1254_s25  }
  0x11   : > { %s1121_s16 = sshll.u32 (%p48_p3), %s1270_s29, 3  ;;  %s1120_s17 = sshll.u32 (%p48_p3), %s263_s15, 5 }
  0x12   : > { %s267_s18 = sadd.s32 (%p48_p3), %s1266_s28, %s1121_s16  ;;  %s265_s23 = scalar_lea.vmem (%p48_p3), [#allocation2], %s1120_s17 }
  0x13   : > { %s1122_s19 = sshll.u32 (%p48_p3), %s267_s18, 3 }
  0x14   : > { %s269_s22 = scalar_lea.vmem (%p48_p3), %s1565_s0, %s1122_s19 }
  0x15   : > { %v304_v0 = vld [vmem:[%s269_s22] sm:$0xff]  ;;  %v306_v1 = vld [vmem:[%s269_s22 + $0x10] sm:$0xff] }
  0x16   : > { %v308_v2 = vld [vmem:[%s269_s22 + $0x20] sm:$0xff]  ;;  %305 = vst [vmem:[%s265_s23] sm:$0xff] %v304_v0  ;;  %307 = vst [vmem:[%s265_s23 + $0x8] sm:$0xff] %v306_v1  ;;  %v310_v3 = vld [vmem:[%s269_s22 + $0x30] sm:$0xff] }
  0x17   : > { %309 = vst [vmem:[%s265_s23 + $0x10] sm:$0xff] %v308_v2  ;;  %311 = vst [vmem:[%s265_s23 + $0x18] sm:$0xff] %v310_v3 }
  0x18 PF: > { %p1123_p7 = scmp.ge.s32.totalorder %s1274_s30, 1  ;;  %p355_p8 = scmp.lt.s32.totalorder %s1274_s30, 5 }
  0x1a   : > { %p356_p9 = pnand %p1123_p7, %p355_p8 }
  0x1b   : > { %s362_s10 = sand.u32 (!%p356_p9), 1, %s1250_s24   ;;  %p430_p10 = scmp.lt.s32.totalorder (!%p356_p9), %s1258_s26, 1 }
  0x1c   : > { %359 = sbr.rel (%p356_p9) target bundleno = 524 (0x20c), region = 78  ;;  %s1124_s11 = sshll.u32 (!%p356_p9), %s362_s10, 5 }
  0x1d   : > { %s1384_s12 = scalar_lea.vmem (!%p356_p9), [#allocation2], %s1124_s11  ;;  %p454_p11 = scmp.lt.s32.totalorder (!%p356_p9), %s1262_s27, 1 }
  0x1e   : > { %s1276_s19 = smov (!%p356_p9), 120  }
  0x21   : > { %v483_v4 = vlaneseq  ;;  %s1586_s26 = smov (!%p430_p10, %s1258_s26), 1  ;;  %v1387_v7 = vld [vmem:[%s1384_s12] sm:$0xff]  ;;  %v1390_v8 = vld [vmem:[%s1384_s12 + $0x8] sm:$0xff]  ;;  %v1401_v11 = vld [vmem:[%s1384_s12 + $0x10] sm:$0xff]  ;;  %s1588_s27 = smov (!%p454_p11, %s1262_s27), 1  ;;  %vm594_vm0 = vcmask 130048  }
  0x22   : > { %s1149_s24 = sshll.u32 %s1586_s26, 3  ;;  %s1129_s13 = sshll.u32 %s1586_s26, 1  ;;  %v482_v12 = vmul.f32 %v1387_v7, %v1387_v7  ;;  %v519_v18 = vmul.f32 %v1390_v8, %v1390_v8  ;;  %v544_v29 = vmul.f32 %v1401_v11, %v1401_v11  ;;  %v1420_v38 = vld [vmem:[%s1384_s12 + $0x18] sm:$0xff]  ;;  %vm610_vm1 = vcmask 64512  }
  0x23   : > { %v484_v5 = vshrl.u32 %v483_v4, 7  ;;  %v624_v6 = vand.u32 127, %v483_v4  ;;  %s434_s17 = scalar_lea.vmem %s1566_s1, %s1149_s24  ;;  %s439_s20 = scalar_lea.vmem %s1567_s2, %s1149_s24  ;;  %v569_v49 = vmul.f32 %v1420_v38, %v1420_v38  ;;  %vm633_vm2 = vcmask 1041409  }
  0x24   : > { %s443_s23 = scalar_lea.vmem %s1568_s3, %s1129_s13  ;;  %v476_v15 = vld [vmem:[%s434_s17] sm:$0xf]  ;;  %v477_v16 = vld [vmem:[%s434_s17 + $0x4] sm:$0xf]  ;;  %s1138_s10 = sshll.u32 %s1588_s27, 2  ;;  %vm636_vm3 = vcmask 58368  }
  0x25   : > { %v485_v9 = vsub.s32 0, %v484_v5  ;;  %v522_v10 = vsub.s32 1, %v484_v5  ;;  %v547_v13 = vsub.s32 2, %v484_v5  ;;  %v1405_v14 = vsub.s32 %v624_v6, %v484_v5  ;;  %v478_v17 = vld [vmem:[%s439_s20] sm:$0xf]  ;;  %s1432_s11 = sadd.s32 %s1138_s10, %s1129_s13  ;;  %s1439_s12 = sshll.u32 %s1586_s26, 2 }
  0x26   : > { %v479_v19 = vld [vmem:[%s439_s20 + $0x4] sm:$0xf]  ;;  %v1140_v24 = vld [vmem:[%s443_s23] ss:$0 sm:$0xff]  ;;  %v1141_v25 = vld [vmem:[%s443_s23 + $0x1] ss:$0 sm:$0xff]  ;;  %s453_s20 = scalar_lea.vmem %s1570_s5, %s1439_s12  ;;  %s448_s23 = scalar_lea.vmem %s1569_s4, %s1439_s12 }
  0x27   : > { %v486_v20 = vrot.slane %v476_v15, %v485_v9  ;;  %v490_v21 = vrot.slane %v477_v16, %v485_v9  ;;  %v510_v22 = vrot.slane %v478_v17, %v485_v9  ;;  %v523_v23 = vrot.slane %v476_v15, %v522_v10  ;;  %s1135_s24 = sshll.u32 %s1588_s27, 3  ;;  %s1139_s10 = sshll.u32 %s1432_s11, 1 }
  0x28   : > { %v514_v26 = vrot.slane %v479_v19, %v485_v9  ;;  %v527_v27 = vrot.slane %v477_v16, %v522_v10  ;;  %v535_v28 = vrot.slane %v478_v17, %v522_v10  ;;  %v539_v33 = vrot.slane %v479_v19, %v522_v10  ;;  %s460_s13 = sadd.s32 %s1439_s12, %s1135_s24 }
  0x29   : > { %v491_v30 = vmul.f32 %v486_v20, %v482_v12  ;;  %v492_v31 = vmul.f32 %v490_v21, %v482_v12  ;;  %v515_v32 = vmul.f32 %v510_v22, %v1387_v7  ;;  %v528_v35 = vmul.f32 %v523_v23, %v519_v18  ;;  %s1136_s15 = sshll.u32 %s460_s13, 3 }
  0x2a   : > { %v516_v34 = vmul.f32 %v514_v26, %v1387_v7  ;;  %v529_v36 = vmul.f32 %v527_v27, %v519_v18  ;;  %v572_v37 = vsub.s32 3, %v484_v5  ;;  %v548_v41 = vrot.slane %v476_v15, %v547_v13  ;;  %s1446_s18 = scalar_lea.vmem %s1571_s6, %s1136_s15  ;;  %s471_s15 = scalar_lea.vmem %s1572_s7, %s1139_s10 }
  0x2b   : > { %v505_v39 = vadd.f32 %v1140_v24, %v491_v30  ;;  %v506_v40 = vadd.f32 %v1141_v25, %v492_v31  ;;  %v552_v42 = vrot.slane %v477_v16, %v547_v13  ;;  %v560_v43 = vrot.slane %v478_v17, %v547_v13 }
  0x2c   : > { %v564_v44 = vrot.slane %v479_v19, %v547_v13  ;;  %v540_v47 = vmul.f32 %v535_v28, %v1390_v8  ;;  %v541_v48 = vmul.f32 %v539_v33, %v1390_v8  ;;  %v573_v50 = vrot.slane %v476_v15, %v572_v37 }
  0x2d   : > { %v517_v45 = vadd.f32 %v515_v32, %v505_v39  ;;  %v518_v46 = vadd.f32 %v516_v34, %v506_v40  ;;  %v577_v51 = vrot.slane %v477_v16, %v572_v37  ;;  %v553_v54 = vmul.f32 %v548_v41, %v544_v29 }
  0x2e   : > { %v554_v55 = vmul.f32 %v552_v42, %v544_v29  ;;  %v565_v56 = vmul.f32 %v560_v43, %v1401_v11  ;;  %v566_v57 = vmul.f32 %v564_v44, %v1401_v11  ;;  %v585_v60 = vrot.slane %v478_v17, %v572_v37 }
  0x2f   : > { %v530_v52 = vadd.f32 %v528_v35, %v517_v45  ;;  %v531_v53 = vadd.f32 %v529_v36, %v518_v46  ;;  %v589_v61 = vrot.slane %v479_v19, %v572_v37  ;;  %v578_v0 = vmul.f32 %v573_v50, %v569_v49 }
  0x30   : > { %v579_v1 = vmul.f32 %v577_v51, %v569_v49  ;;  %v590_v4 = vmul.f32 %v585_v60, %v1420_v38  ;;  %vm732_vm4 = vcmask 7168   ;;  %vm734_vm5 = vcmask 15360  }
  0x31   : > { %v542_v58 = vadd.f32 %v540_v47, %v530_v52  ;;  %v543_v59 = vadd.f32 %v541_v48, %v531_v53  ;;  %v591_v5 = vmul.f32 %v589_v61, %v1420_v38  ;;  %vm736_vm6 = vcmask 23552  }
  0x32   : > { %vm744_vm7 = vcmask 25600  }
  0x33   : > { %v555_v62 = vadd.f32 %v553_v54, %v542_v58  ;;  %v556_v63 = vadd.f32 %v554_v55, %v543_v59 }
  0x35   : > { %v567_v2 = vadd.f32 %v565_v56, %v555_v62  ;;  %v568_v3 = vadd.f32 %v566_v57, %v556_v63 }
  0x37   : > { %v580_v6 = vadd.f32 %v578_v0, %v567_v2  ;;  %v581_v9 = vadd.f32 %v579_v1, %v568_v3 }
  0x39   : > { %v592_v10 = vadd.f32 %v590_v4, %v580_v6  ;;  %v593_v12 = vadd.f32 %v591_v5, %v581_v9 }
  0x3b   : > { %v595_v13 = vsel %vm594_vm0, %v592_v10, -inf  ;;  %v596_v15 = vsel %vm594_vm0, %v593_v12, -inf }
  0x3c   : > { %v597_v16 = vmax.f32 %v595_v13, %v596_v15 }
  0x3e   : > { %v598_v17 = vsub.f32 %v592_v10, %v597_v16  ;;  %v599_v18 = vsub.f32 %v593_v12, %v597_v16 }
  0x40   : > { %v600_v19 = vmul.f32 1.442695, %v598_v17  ;;  %v602_v20 = vmul.f32 1.442695, %v599_v18 }
  0x42   : > { %1210 = vpow2.f32 %v600_v19 }
  0x43   : > { %1212 = vpow2.f32 %v602_v20 }
  0x4f   : > { %v1211_v21 = vpop.eup %1210 }
  0x50   : > { %v1213_v22 = vpop.eup %1212  ;;  %v604_v23 = vsel %vm594_vm0, %v1211_v21, 0.0 }
  0x51   : > { %v605_v24 = vsel %vm594_vm0, %v1213_v22, 0.0 }
  0x52   : > { %v606_v25 = vadd.f32 %v605_v24, %v604_v23 }
  0x54   : > { %1214 = vrcp.f32 %v606_v25 }
  0x61   : > { %v1215_v26 = vpop.eup %1214 }
  0x62   : > { %v608_v27 = vmul.f32 %v1215_v26, %v1211_v21  ;;  %v609_v28 = vmul.f32 %v1215_v26, %v1213_v22 }
  0x64   : > { %748 = vrot.lane.b32.xlu0 %v608_v27, %s1276_s19  ;;  %v640_v29 = vmul.f32 %v608_v27, %v1387_v7  ;;  %612 = vst.msk [vmem:[%s1446_s18 + $0x8] sm:$0xff] %vm610_vm1, %v609_v28  ;;  %611 = vst.msk [vmem:[%s1446_s18] sm:$0xff] %vm610_vm1, %v608_v27  ;;  %v641_v30 = vmul.f32 %v609_v28, %v1387_v7  ;;  %v663_v31 = vmul.f32 %v608_v27, %v1390_v8 }
  0x65   : > { %v664_v32 = vmul.f32 %v609_v28, %v1390_v8  ;;  %v686_v33 = vmul.f32 %v608_v27, %v1401_v11  ;;  %v687_v34 = vmul.f32 %v609_v28, %v1401_v11  ;;  %v709_v35 = vmul.f32 %v608_v27, %v1420_v38 }
  0x66   : > { %784 = vrot.lane.b32.xlu1 %v640_v29, %s1276_s19  ;;  %v710_v36 = vmul.f32 %v609_v28, %v1420_v38  ;;  %v615_v7 = vsel %vm610_vm1, %v608_v27, 0.0  ;;  %v645_v37 = vsel %vm610_vm1, %v641_v30, 0.0  ;;  %v618_v8 = vsel %vm610_vm1, %v609_v28, 0.0 }
  0x67   : > { %v668_v39 = vsel %vm610_vm1, %v664_v32, 0.0  ;;  %v642_v11 = vsel %vm610_vm1, %v640_v29, 0.0  ;;  %v691_v40 = vsel %vm610_vm1, %v687_v34, 0.0  ;;  %v665_v38 = vsel %vm610_vm1, %v663_v31, 0.0 }
  0x68   : > { %750 = vrot.lane.b32.xlu0 %v609_v28, %s1276_s19  ;;  %v714_v41 = vsel %vm610_vm1, %v710_v36, 0.0  ;;  %v688_v42 = vsel %vm610_vm1, %v686_v33, 0.0  ;;  %v711_v43 = vsel %vm610_vm1, %v709_v35, 0.0 }
  0x6a   : > { %786 = vrot.lane.b32.xlu1 %v641_v30, %s1276_s19 }
  0x6c   : > { %813 = vrot.lane.b32.xlu0 %v663_v31, %s1276_s19 }
  0x6e   : > { %815 = vrot.lane.b32.xlu1 %v664_v32, %s1276_s19 }
  0x70   : > { %842 = vrot.lane.b32.xlu0 %v686_v33, %s1276_s19 }
  0x72   : > { %844 = vrot.lane.b32.xlu1 %v687_v34, %s1276_s19 }
  0x74   : > { %871 = vrot.lane.b32.xlu0 %v709_v35, %s1276_s19 }
  0x76   : > { %873 = vrot.lane.b32.xlu1 %v710_v36, %s1276_s19 }
  0x93   : > { %616 = vadd.xlane.f32.xlu0 %v615_v7 }
  0x97   : > { %646 = vadd.xlane.f32.xlu0 %v645_v37 }
  0x9a   : > { %619 = vadd.xlane.f32.xlu1 %v618_v8 }
  0x9b   : > { %669 = vadd.xlane.f32.xlu0 %v668_v39 }
  0x9e   : > { %643 = vadd.xlane.f32.xlu1 %v642_v11 }
  0x9f   : > { %692 = vadd.xlane.f32.xlu0 %v691_v40 }
  0xa2   : > { %666 = vadd.xlane.f32.xlu1 %v665_v38 }
  0xa3   : > { %715 = vadd.xlane.f32.xlu0 %v714_v41 }
  0xa6   : > { %689 = vadd.xlane.f32.xlu1 %v688_v42 }
  0xaa   : > { %712 = vadd.xlane.f32.xlu1 %v711_v43 }
  0xd6   : > { %v749_v44 = vpop.permute.xlu0 %748 }
  0xd7   : > { %1142 = vst.msk [vmem:[%s1446_s18 + $0x10] sm:$0xff] %vm610_vm1, %v749_v44  ;;  %v761_v45 = vsel %vm610_vm1, %v749_v44, 0.0 }
  0xd8   : > { %762 = vadd.xlane.f32.xlu0 %v761_v45  ;;  %v785_v46 = vpop.permute.xlu1 %784 }
  0xd9   : > { %v790_v47 = vsel %vm610_vm1, %v785_v46, 0.0 }
  0xda   : > { %v751_v48 = vpop.permute.xlu0 %750  ;;  %791 = vadd.xlane.f32.xlu1 %v790_v47 }
  0xdb   : > { %1143 = vst.msk [vmem:[%s1446_s18 + $0x18] sm:$0xff] %vm610_vm1, %v751_v48  ;;  %v764_v49 = vsel %vm610_vm1, %v751_v48, 0.0 }
  0xdc   : > { %765 = vadd.xlane.f32.xlu0 %v764_v49  ;;  %v787_v50 = vpop.permute.xlu1 %786 }
  0xdd   : > { %v793_v51 = vsel %vm610_vm1, %v787_v50, 0.0 }
  0xde   : > { %v814_v52 = vpop.permute.xlu0 %813 }
  0xdf   : > { %v819_v53 = vsel %vm610_vm1, %v814_v52, 0.0 }
  0xe0   : > { %794 = vadd.xlane.f32.xlu0 %v793_v51  ;;  %v816_v54 = vpop.permute.xlu1 %815  ;;  %820 = vadd.xlane.f32.xlu1 %v819_v53 }
  0xe1   : > { %v822_v55 = vsel %vm610_vm1, %v816_v54, 0.0 }
  0xe2   : > { %v843_v56 = vpop.permute.xlu0 %842 }
  0xe3   : > { %v848_v57 = vsel %vm610_vm1, %v843_v56, 0.0 }
  0xe4   : > { %823 = vadd.xlane.f32.xlu0 %v822_v55  ;;  %v845_v58 = vpop.permute.xlu1 %844  ;;  %849 = vadd.xlane.f32.xlu1 %v848_v57 }
  0xe5   : > { %v851_v59 = vsel %vm610_vm1, %v845_v58, 0.0 }
  0xe6   : > { %v872_v60 = vpop.permute.xlu0 %871 }
  0xe7   : > { %v877_v61 = vsel %vm610_vm1, %v872_v60, 0.0 }
  0xe8   : > { %852 = vadd.xlane.f32.xlu0 %v851_v59  ;;  %v874_v62 = vpop.permute.xlu1 %873  ;;  %878 = vadd.xlane.f32.xlu1 %v877_v61 }
  0xe9   : > { %v880_v63 = vsel %vm610_vm1, %v874_v62, 0.0 }
  0xec   : > { %881 = vadd.xlane.f32.xlu0 %v880_v63 }
 0x11c   : > { %v617_v0 = vpop.xlane.xlu0 %616 }
 0x11d   : > { %v628_v2 = vrot.slane %v617_v0, %v1405_v14 }
 0x120   : > { %v647_v1 = vpop.xlane.xlu0 %646 }
 0x121   : > { %v657_v6 = vrot.slane %v647_v1, %v1405_v14 }
 0x123   : > { %v620_v3 = vpop.xlane.xlu1 %619 }
 0x124   : > { %v632_v4 = vrot.slane %v620_v3, %v1405_v14  ;;  %v670_v5 = vpop.xlane.xlu0 %669 }
 0x125   : > { %v680_v16 = vrot.slane %v670_v5, %v1405_v14 }
 0x126   : > { %v634_v9 = vsel %vm633_vm2, %v632_v4, %v628_v2  ;;  %v614_v2 = vld [vmem:[%s453_s20] sm:$0x3] }
 0x127   : > { %v644_v10 = vpop.xlane.xlu1 %643  ;;  %v637_v12 = vsel %vm636_vm3, %v634_v9, 0.0  ;;  %v613_v4 = vld [vmem:[%s448_s23] sm:$0x3] }
 0x128   : > { %v653_v13 = vrot.slane %v644_v10, %v1405_v14  ;;  %638 = vadd.xlane.f32.xlu1 %v637_v12  ;;  %v693_v15 = vpop.xlane.xlu0 %692 }
 0x129   : > { %v703_v21 = vrot.slane %v693_v15, %v1405_v14 }
 0x12a   : > { %v658_v17 = vsel %vm633_vm2, %v657_v6, %v653_v13 }
 0x12b   : > { %v667_v18 = vpop.xlane.xlu1 %666  ;;  %v660_v19 = vsel %vm636_vm3, %v658_v17, 0.0 }
 0x12c   : > { %v676_v20 = vrot.slane %v667_v18, %v1405_v14  ;;  %661 = vadd.xlane.f32.xlu0 %v660_v19  ;;  %v716_v24 = vpop.xlane.xlu0 %715 }
 0x12d   : > { %v726_v27 = vrot.slane %v716_v24, %v1405_v14 }
 0x12e   : > { %v681_v22 = vsel %vm633_vm2, %v680_v16, %v676_v20 }
 0x12f   : > { %v690_v23 = vpop.xlane.xlu1 %689  ;;  %v683_v25 = vsel %vm636_vm3, %v681_v22, 0.0 }
 0x130   : > { %v699_v26 = vrot.slane %v690_v23, %v1405_v14  ;;  %684 = vadd.xlane.f32.xlu1 %v683_v25  ;;  %v1144_v23 = vld [vmem:[%s448_s23 + $0x2] sm:$0x3] }
 0x132   : > { %v704_v28 = vsel %vm633_vm2, %v703_v21, %v699_v26  ;;  %v1145_v21 = vld [vmem:[%s453_s20 + $0x2] sm:$0x3] }
 0x133   : > { %v713_v29 = vpop.xlane.xlu1 %712  ;;  %v706_v30 = vsel %vm636_vm3, %v704_v28, 0.0 }
 0x134   : > { %v722_v31 = vrot.slane %v713_v29, %v1405_v14  ;;  %707 = vadd.xlane.f32.xlu0 %v706_v30 }
 0x136   : > { %v727_v32 = vsel %vm633_vm2, %v726_v27, %v722_v31 }
 0x137   : > { %v729_v33 = vsel %vm636_vm3, %v727_v32, 0.0 }
 0x138   : > { %730 = vadd.xlane.f32.xlu1 %v729_v33 }
 0x161   : > { %v763_v34 = vpop.xlane.xlu0 %762 }
 0x162   : > { %v772_v7 = vrot.slane %v763_v34, %v1405_v14 }
 0x163   : > { %v792_v35 = vpop.xlane.xlu1 %791 }
 0x164   : > { %v801_v38 = vrot.slane %v792_v35, %v1405_v14 }
 0x165   : > { %v766_v36 = vpop.xlane.xlu0 %765 }
 0x166   : > { %v776_v37 = vrot.slane %v766_v36, %v1405_v14 }
 0x168   : > { %v777_v8 = vsel %vm633_vm2, %v776_v37, %v772_v7 }
 0x169   : > { %v795_v39 = vpop.xlane.xlu0 %794  ;;  %v779_v11 = vsel %vm636_vm3, %v777_v8, 0.0  ;;  %v821_v40 = vpop.xlane.xlu1 %820 }
 0x16a   : > { %v805_v41 = vrot.slane %v795_v39, %v1405_v14  ;;  %780 = vadd.xlane.f32.xlu0 %v779_v11  ;;  %v830_v42 = vrot.slane %v821_v40, %v1405_v14 }
 0x16c   : > { %v806_v43 = vsel %vm633_vm2, %v805_v41, %v801_v38 }
 0x16d   : > { %v824_v44 = vpop.xlane.xlu0 %823  ;;  %v808_v45 = vsel %vm636_vm3, %v806_v43, 0.0  ;;  %v850_v46 = vpop.xlane.xlu1 %849 }
 0x16e   : > { %v834_v47 = vrot.slane %v824_v44, %v1405_v14  ;;  %809 = vadd.xlane.f32.xlu1 %v808_v45  ;;  %v859_v48 = vrot.slane %v850_v46, %v1405_v14 }
 0x170   : > { %v835_v49 = vsel %vm633_vm2, %v834_v47, %v830_v42 }
 0x171   : > { %v853_v50 = vpop.xlane.xlu0 %852  ;;  %v837_v51 = vsel %vm636_vm3, %v835_v49, 0.0  ;;  %v879_v52 = vpop.xlane.xlu1 %878 }
 0x172   : > { %v863_v53 = vrot.slane %v853_v50, %v1405_v14  ;;  %838 = vadd.xlane.f32.xlu0 %v837_v51  ;;  %v888_v54 = vrot.slane %v879_v52, %v1405_v14 }
 0x174   : > { %v864_v55 = vsel %vm633_vm2, %v863_v53, %v859_v48 }
 0x175   : > { %v882_v56 = vpop.xlane.xlu0 %881  ;;  %v866_v57 = vsel %vm636_vm3, %v864_v55, 0.0 }
 0x176   : > { %v892_v58 = vrot.slane %v882_v56, %v1405_v14  ;;  %867 = vadd.xlane.f32.xlu1 %v866_v57 }
 0x178   : > { %v893_v59 = vsel %vm633_vm2, %v892_v58, %v888_v54 }
 0x179   : > { %v895_v60 = vsel %vm636_vm3, %v893_v59, 0.0 }
 0x17a   : > { %896 = vadd.xlane.f32.xlu0 %v895_v60 }
 0x1b1   : > { %v639_v61 = vpop.xlane.xlu1 %638 }
 0x1b2   : > { %v741_v62 = vadd.f32 1e-09, %v639_v61  ;;  %v739_v5 = vmul.f32 %v639_v61, %v614_v2 }
 0x1b4   : > { %1216 = vrcp.f32 %v741_v62 }
 0x1b5   : > { %v662_v63 = vpop.xlane.xlu0 %661 }
 0x1b9   : > { %v685_v0 = vpop.xlane.xlu1 %684 }
 0x1ba   : > { %v733_v1 = vsel %vm732_vm4, %v662_v63, %v685_v0 }
 0x1bd   : > { %v708_v14 = vpop.xlane.xlu0 %707 }
 0x1be   : > { %v735_v3 = vsel %vm734_vm5, %v733_v1, %v708_v14 }
 0x1c1   : > { %v731_v6 = vpop.xlane.xlu1 %730  ;;  %v1217_v12 = vpop.eup %1216 }
 0x1c2   : > { %v737_v9 = vsel %vm736_vm6, %v735_v3, %v731_v6 }
 0x1c3   : > { %v738_v10 = vmul.f32 %v737_v9, %v613_v4 }
 0x1c5   : > { %v740_v13 = vsub.f32 %v738_v10, %v739_v5 }
 0x1c7   : > { %v743_v15 = vmul.f32 %v1217_v12, %v740_v13 }
 0x1c9   : > { %745 = vst.msk [vmem:[%s471_s15] sm:$0x3] %vm744_vm7, %v743_v15 }
 0x1f3   : > { %v781_v16 = vpop.xlane.xlu0 %780 }
 0x1f4   : > { %v904_v17 = vadd.f32 1e-09, %v781_v16  ;;  %v902_v27 = vmul.f32 %v1145_v21, %v781_v16 }
 0x1f6   : > { %1218 = vrcp.f32 %v904_v17 }
 0x1f7   : > { %v810_v18 = vpop.xlane.xlu1 %809 }
 0x1fb   : > { %v839_v19 = vpop.xlane.xlu0 %838 }
 0x1fc   : > { %v898_v22 = vsel %vm732_vm4, %v810_v18, %v839_v19 }
 0x1ff   : > { %v868_v20 = vpop.xlane.xlu1 %867 }
 0x200   : > { %v899_v24 = vsel %vm734_vm5, %v898_v22, %v868_v20 }
 0x203   : > { %v897_v25 = vpop.xlane.xlu0 %896  ;;  %v1219_v30 = vpop.eup %1218 }
 0x204   : > { %v900_v26 = vsel %vm736_vm6, %v899_v24, %v897_v25 }
 0x205   : > { %v901_v28 = vmul.f32 %v1144_v23, %v900_v26 }
 0x207   : > { %v903_v29 = vsub.f32 %v901_v28, %v902_v27 }
 0x209   : > { %v906_v31 = vmul.f32 %v1219_v30, %v903_v29 }
 0x20b   : > { %1146 = vst.msk [vmem:[%s471_s15 + $0x2] sm:$0x3] %vm744_vm7, %v906_v31 }
 0x20c PF: > { %s18_s30 = sadd.s32 1, %s1274_s30   ;;  %s1573_s24 = smov %s1254_s25 }
 0x20d   : > { %p15_p12 = scmp.ge.s32.totalorder %s18_s30, 6   ;;  %s1574_s25 = smov %s1368_s14 }
 0x20e   : > { %s1575_s26 = smov %s1266_s28  ;;  %s1576_s27 = smov %s1270_s29 }
 0x20f   : > { %s1577_s28 = smov %s1580_s8  ;;  %s1578_s29 = smov %s1584_s9 }
 0x210   :  { %17 = sbr.rel (!%p15_p12) target bundleno = 4 (0x4), region = 148 }

</bundles_post_ra>
